<compile_context>
chip_gen: v5e
topology: v5e:2x2
jax: 0.10.0
libtpu: 0.0.40
codegen_flags: <defaults>
</compile_context>

<pallas_src>
import functools
import math

import jax
import jax.numpy as jnp
from jax import lax
from jax.experimental import pallas as pl
from jax.experimental.pallas import tpu as pltpu


def _self_attention_kernel(x_ref, wqkv_ref, bqkv_ref, y_ref, attn_ref, qkv_ref,
                           *, proj_chunk, softmax_bf16):
    qi = pl.program_id(1)
    S = qkv_ref.shape[1]
    tq = y_ref.shape[1]

    # ---- fused QKV projection, once per batch element, chunked over S ----
    @pl.when(qi == 0)
    def _():
        n_chunks = S // proj_chunk

        @pl.loop(0, n_chunks)
        def _(c):
            r0 = pl.multiple_of(c * proj_chunk, proj_chunk)
            xc = x_ref[0, pl.ds(r0, proj_chunk), :]            # (chunk, D) bf16
            for h in range(3):                                  # Q, K, V (static)
                proj = jnp.dot(xc, wqkv_ref[h],
                               preferred_element_type=jnp.float32)
                proj = proj + bqkv_ref[h]                       # f32 bias add
                qkv_ref[h, pl.ds(r0, proj_chunk), :] = proj.astype(qkv_ref.dtype)

    # ---- attention for this query tile ----
    row0 = pl.multiple_of(qi * tq, tq)
    q = qkv_ref[0, pl.ds(row0, tq), :]      # (tq, D) bf16, 1/sqrt(d_k) pre-folded
    k = qkv_ref[1]                          # (S, D)  bf16
    v = qkv_ref[2]                          # (S, D)  bf16

    # scores[i, j] = sum_d q[i, d] * k[j, d]   (no materialized k.T)
    scores = lax.dot_general(q, k,
                             dimension_numbers=(((1,), (1,)), ((), ())),
                             preferred_element_type=jnp.float32)   # (tq, S) f32

    # Numerically stable softmax along the last axis.
    m = jnp.max(scores, axis=-1, keepdims=True)
    z = scores - m
    if softmax_bf16:
        # bf16 numerator (v6e/v7x have bf16 VPU/EUP); max/denominator in f32.
        e = jnp.exp(z.astype(jnp.bfloat16))                         # (tq, S) bf16
        denom = jnp.sum(e, axis=-1, keepdims=True, dtype=jnp.float32)
        inv = pl.reciprocal(denom, approx=True).astype(jnp.bfloat16)
        p = e * inv                                                 # (tq, S) bf16
    else:
        e = jnp.exp(z)
        denom = jnp.sum(e, axis=-1, keepdims=True)
        p = e * pl.reciprocal(denom, approx=True)                   # (tq, S) f32

    y = jnp.dot(p.astype(v.dtype), v,
                preferred_element_type=jnp.float32)                 # (tq, D) f32

    y_ref[0] = y.astype(y_ref.dtype)
    attn_ref[0] = p.astype(attn_ref.dtype)


def self_attention(x, wq, bq, wk, bk, wv, bv, *, tq=None):
    """x: (B, S, D) f32; w*: (D, D) PyTorch layout (out, in); b*: (D,) f32."""
    B, S, D = x.shape

    # --- generation detection (drives VMEM budget / tq / softmax dtype) ---
    kind = ""
    try:
        kind = jax.devices()[0].device_kind.lower()
    except Exception:
        pass
    is_v7x = ("v7" in kind) or ("7x" in kind)
    is_v5 = "v5" in kind
    is_v6 = "v6" in kind

    if tq is None:
        if S <= 256:
            tq = S
        else:
            tq = S
            for cand in ([512] if is_v6 else []) + [256, 128, 64, 32, 16, 8]:
                if S % cand == 0:
                    tq = cand
                    break
    assert S % tq == 0, "query tile must divide S"
    n_qt = S // tq

    # d_k == dim (see module note); fold 1/sqrt(d_k) into Q's weight & bias.
    scale = 1.0 / math.sqrt(float(D))

    # (3, D, D) pre-transposed weights and (3, 1, D) biases: Q (pre-scaled), K, V.
    wqkv = jnp.stack([wq.T * scale, wk.T, wv.T], axis=0)
    bqkv = jnp.stack([bq * scale, bk, bv], axis=0).reshape(3, 1, D)

    # bf16 MXU operands; all accumulation inside the kernel is f32.
    x_bf = x.astype(jnp.bfloat16)
    wqkv_bf = wqkv.astype(jnp.bfloat16)
    bqkv_f32 = bqkv.astype(jnp.float32)

    vmem_limit = (56 if is_v7x else 100) * 1024 * 1024
    softmax_bf16 = not is_v5   # v5e has no bf16 VPU/EUP -> keep f32 there

    kernel = functools.partial(_self_attention_kernel,
                               proj_chunk=tq, softmax_bf16=softmax_bf16)

    def make_call(single_buffer):
        def const_spec(shape, imap):
            if single_buffer:
                return pl.BlockSpec(shape, imap, pipeline_mode=pl.Buffered(1))
            return pl.BlockSpec(shape, imap)

        # x's block index only changes with b; single-buffer it on v7x (64 MiB VMEM).
        if single_buffer and is_v7x:
            x_spec = const_spec((1, S, D), lambda b, qi: (b, 0, 0))
        else:
            x_spec = pl.BlockSpec((1, S, D), lambda b, qi: (b, 0, 0))

        return pl.pallas_call(
            kernel,
            out_shape=(
                jax.ShapeDtypeStruct((B, S, D), jnp.float32),
                jax.ShapeDtypeStruct((B, S, S), jnp.float32),
            ),
            grid_spec=pltpu.PrefetchScalarGridSpec(
                num_scalar_prefetch=0,
                grid=(B, n_qt),
                in_specs=[
                    x_spec,                                               # x
                    const_spec((3, D, D), lambda b, qi: (0, 0, 0)),       # wqkv
                    const_spec((3, 1, D), lambda b, qi: (0, 0, 0)),       # bqkv
                ],
                out_specs=[
                    pl.BlockSpec((1, tq, D), lambda b, qi: (b, qi, 0)),   # Y
                    pl.BlockSpec((1, tq, S), lambda b, qi: (b, qi, 0)),   # attention
                ],
                scratch_shapes=[pltpu.VMEM((3, S, D), jnp.bfloat16)],     # Q/K/V slab
            ),
            compiler_params=pltpu.CompilerParams(
                dimension_semantics=("parallel", "arbitrary"),
                vmem_limit_bytes=vmem_limit),
        )

    try:
        y, attn = make_call(True)(x_bf, wqkv_bf, bqkv_f32)
    except Exception:
        # Fallback if pipeline_mode=pl.Buffered(1) is rejected by this jax build.
        y, attn = make_call(False)(x_bf, wqkv_bf, bqkv_f32)
    return y, attn


def _reference(x, wq, bq, wk, bk, wv, bv):
    q = x @ wq.T + bq
    k = x @ wk.T + bk
    v = x @ wv.T + bv
    d = x.shape[-1]
    w = jnp.einsum("bsd,btd->bst", q, k) / jnp.sqrt(jnp.float32(d))
    attn = jax.nn.softmax(w, axis=-1)
    y = jnp.einsum("bst,btd->bsd", attn, v)
    return y, attn


if __name__ == "__main__":
    B, S, D = 2, 8, 32
    key = jax.random.PRNGKey(0)
    kx, kq, kbq, kk, kbk, kv, kbv = jax.random.split(key, 7)

    x = jax.random.normal(kx, (B, S, D), dtype=jnp.float32)

    # Deterministic init mimicking nn.Linear default: U(-1/sqrt(D), 1/sqrt(D))
    bound = 1.0 / math.sqrt(D)
    wq = jax.random.uniform(kq, (D, D), jnp.float32, -bound, bound)
    bq = jax.random.uniform(kbq, (D,), jnp.float32, -bound, bound)
    wk = jax.random.uniform(kk, (D, D), jnp.float32, -bound, bound)
    bk = jax.random.uniform(kbk, (D,), jnp.float32, -bound, bound)
    wv = jax.random.uniform(kv, (D, D), jnp.float32, -bound, bound)
    bv = jax.random.uniform(kbv, (D,), jnp.float32, -bound, bound)

    y, attn = self_attention(x, wq, bq, wk, bk, wv, bv)
    jax.block_until_ready((y, attn))

    y_ref, attn_ref = _reference(x, wq, bq, wk, bk, wv, bv)
    # bf16 MXU operands + bf16 softmax numerator (f32 accumulation) -> relaxed
    # tolerance vs. the f32 reference.
    assert jnp.allclose(y, y_ref, atol=3e-2, rtol=3e-2)
    assert jnp.allclose(attn, attn_ref, atol=3e-2, rtol=3e-2)

    print("KERNEL_OK")
</pallas_src>

<mosaic_0001>
module attributes {stable_mosaic.version = 11 : i64} {
  func.func @_self_attention_kernel(%arg0: i32, %arg1: i32, %arg2: memref<1x8x32xbf16, #tpu.memory_space<vmem>>, %arg3: memref<3x32x32xbf16, #tpu.memory_space<vmem>>, %arg4: memref<3x1x32xf32, #tpu.memory_space<vmem>>, %arg5: memref<1x8x32xf32, #tpu.memory_space<vmem>>, %arg6: memref<1x8x8xf32, #tpu.memory_space<vmem>>, %arg7: memref<3x8x32xbf16, #tpu.memory_space<vmem>>) attributes {dimension_semantics = [#tpu.dimension_semantics<parallel>, #tpu.dimension_semantics<arbitrary>], iteration_bounds = array<i64: 2, 1>, scalar_prefetch = 0 : i64, scratch_operands = 1 : i64, tpu.core_type = #tpu.core_type<tc>, window_params = [{transform_indices = @transform_0, window_bounds = array<i64: 1, 8, 32>}, {pipeline_mode = #tpu.pipeline_mode<synchronous>, transform_indices = @transform_1, window_bounds = array<i64: 3, 32, 32>}, {pipeline_mode = #tpu.pipeline_mode<synchronous>, transform_indices = @transform_2, window_bounds = array<i64: 3, 1, 32>}, {transform_indices = @transform_3, window_bounds = array<i64: 1, 8, 32>}, {transform_indices = @transform_4, window_bounds = array<i64: 1, 8, 8>}]} {
    %c0_i32 = arith.constant 0 : i32
    %0 = arith.cmpi eq, %arg1, %c0_i32 : i32
    %1 = arith.extui %0 : i1 to i32
    %c0_i32_0 = arith.constant 0 : i32
    %2 = arith.cmpi ne, %1, %c0_i32_0 : i32
    scf.if %2 {
      %c0_i32_15 = arith.constant 0 : i32
      %c1_i32 = arith.constant 1 : i32
      %34 = arith.muli %c0_i32_15, %c1_i32 : i32
      %c0_i32_16 = arith.constant 0 : i32
      %35 = arith.addi %c0_i32_16, %34 : i32
      %c8_i32_17 = arith.constant 8 : i32
      %36 = arith.muli %35, %c8_i32_17 : i32
      %37 = tpu.assume_multiple %36, 8 : i32
      %c0_18 = arith.constant 0 : index
      %38 = arith.index_cast %37 : i32 to index
      %c0_19 = arith.constant 0 : index
      %39 = vector.load %arg2[%c0_18, %38, %c0_19] : memref<1x8x32xbf16, #tpu.memory_space<vmem>>, vector<1x8x32xbf16>
      %40 = vector.shape_cast %39 : vector<1x8x32xbf16> to vector<8x32xbf16>
      %c0_20 = arith.constant 0 : index
      %c0_21 = arith.constant 0 : index
      %c0_22 = arith.constant 0 : index
      %41 = vector.load %arg3[%c0_20, %c0_21, %c0_22] : memref<3x32x32xbf16, #tpu.memory_space<vmem>>, vector<1x32x32xbf16>
      %42 = vector.shape_cast %41 : vector<1x32x32xbf16> to vector<32x32xbf16>
      %cst_23 = arith.constant dense<0.000000e+00> : vector<8x32xf32>
      %43 = tpu.matmul %40, %42, %cst_23 {dimension_numbers = #tpu.dot_dimension_numbers<[1], [0], [0], [1], [0, 0, 1, 1], [], []>} : vector<8x32xbf16>, vector<32x32xbf16>, vector<8x32xf32> -> vector<8x32xf32>
      %c0_24 = arith.constant 0 : index
      %c0_25 = arith.constant 0 : index
      %c0_26 = arith.constant 0 : index
      %44 = vector.load %arg4[%c0_24, %c0_25, %c0_26] : memref<3x1x32xf32, #tpu.memory_space<vmem>>, vector<1x1x32xf32>
      %45 = vector.shape_cast %44 : vector<1x1x32xf32> to vector<1x32xf32>
      %46 = vector.broadcast %45 : vector<1x32xf32> to vector<8x32xf32>
      %47 = arith.addf %43, %46 : vector<8x32xf32>
      %48 = arith.truncf %47 : vector<8x32xf32> to vector<8x32xbf16>
      %c0_27 = arith.constant 0 : index
      %49 = arith.index_cast %37 : i32 to index
      %c0_28 = arith.constant 0 : index
      %50 = vector.load %arg7[%c0_27, %49, %c0_28] : memref<3x8x32xbf16, #tpu.memory_space<vmem>>, vector<1x8x32xbf16>
      %51 = vector.shape_cast %50 : vector<1x8x32xbf16> to vector<8x32xbf16>
      %52 = vector.shape_cast %48 : vector<8x32xbf16> to vector<1x8x32xbf16>
      tpu.vector_store %arg7[%c0_27, %49, %c0_28], %52 {strides = array<i32>} : memref<3x8x32xbf16, #tpu.memory_space<vmem>>, vector<1x8x32xbf16>,
      %c1_29 = arith.constant 1 : index
      %c0_30 = arith.constant 0 : index
      %c0_31 = arith.constant 0 : index
      %53 = vector.load %arg3[%c1_29, %c0_30, %c0_31] : memref<3x32x32xbf16, #tpu.memory_space<vmem>>, vector<1x32x32xbf16>
      %54 = vector.shape_cast %53 : vector<1x32x32xbf16> to vector<32x32xbf16>
      %cst_32 = arith.constant dense<0.000000e+00> : vector<8x32xf32>
      %55 = tpu.matmul %40, %54, %cst_32 {dimension_numbers = #tpu.dot_dimension_numbers<[1], [0], [0], [1], [0, 0, 1, 1], [], []>} : vector<8x32xbf16>, vector<32x32xbf16>, vector<8x32xf32> -> vector<8x32xf32>
      %c1_33 = arith.constant 1 : index
      %c0_34 = arith.constant 0 : index
      %c0_35 = arith.constant 0 : index
      %56 = vector.load %arg4[%c1_33, %c0_34, %c0_35] : memref<3x1x32xf32, #tpu.memory_space<vmem>>, vector<1x1x32xf32>
      %57 = vector.shape_cast %56 : vector<1x1x32xf32> to vector<1x32xf32>
      %58 = vector.broadcast %57 : vector<1x32xf32> to vector<8x32xf32>
      %59 = arith.addf %55, %58 : vector<8x32xf32>
      %60 = arith.truncf %59 : vector<8x32xf32> to vector<8x32xbf16>
      %c1_36 = arith.constant 1 : index
      %61 = arith.index_cast %37 : i32 to index
      %c0_37 = arith.constant 0 : index
      %62 = vector.load %arg7[%c1_36, %61, %c0_37] : memref<3x8x32xbf16, #tpu.memory_space<vmem>>, vector<1x8x32xbf16>
      %63 = vector.shape_cast %62 : vector<1x8x32xbf16> to vector<8x32xbf16>
      %64 = vector.shape_cast %60 : vector<8x32xbf16> to vector<1x8x32xbf16>
      tpu.vector_store %arg7[%c1_36, %61, %c0_37], %64 {strides = array<i32>} : memref<3x8x32xbf16, #tpu.memory_space<vmem>>, vector<1x8x32xbf16>,
      %c2_38 = arith.constant 2 : index
      %c0_39 = arith.constant 0 : index
      %c0_40 = arith.constant 0 : index
      %65 = vector.load %arg3[%c2_38, %c0_39, %c0_40] : memref<3x32x32xbf16, #tpu.memory_space<vmem>>, vector<1x32x32xbf16>
      %66 = vector.shape_cast %65 : vector<1x32x32xbf16> to vector<32x32xbf16>
      %cst_41 = arith.constant dense<0.000000e+00> : vector<8x32xf32>
      %67 = tpu.matmul %40, %66, %cst_41 {dimension_numbers = #tpu.dot_dimension_numbers<[1], [0], [0], [1], [0, 0, 1, 1], [], []>} : vector<8x32xbf16>, vector<32x32xbf16>, vector<8x32xf32> -> vector<8x32xf32>
      %c2_42 = arith.constant 2 : index
      %c0_43 = arith.constant 0 : index
      %c0_44 = arith.constant 0 : index
      %68 = vector.load %arg4[%c2_42, %c0_43, %c0_44] : memref<3x1x32xf32, #tpu.memory_space<vmem>>, vector<1x1x32xf32>
      %69 = vector.shape_cast %68 : vector<1x1x32xf32> to vector<1x32xf32>
      %70 = vector.broadcast %69 : vector<1x32xf32> to vector<8x32xf32>
      %71 = arith.addf %67, %70 : vector<8x32xf32>
      %72 = arith.truncf %71 : vector<8x32xf32> to vector<8x32xbf16>
      %c2_45 = arith.constant 2 : index
      %73 = arith.index_cast %37 : i32 to index
      %c0_46 = arith.constant 0 : index
      %74 = vector.load %arg7[%c2_45, %73, %c0_46] : memref<3x8x32xbf16, #tpu.memory_space<vmem>>, vector<1x8x32xbf16>
      %75 = vector.shape_cast %74 : vector<1x8x32xbf16> to vector<8x32xbf16>
      %76 = vector.shape_cast %72 : vector<8x32xbf16> to vector<1x8x32xbf16>
      tpu.vector_store %arg7[%c2_45, %73, %c0_46], %76 {strides = array<i32>} : memref<3x8x32xbf16, #tpu.memory_space<vmem>>, vector<1x8x32xbf16>,
      %c1_i32_47 = arith.constant 1 : i32
    } else {
    }
    %c8_i32 = arith.constant 8 : i32
    %3 = arith.muli %arg1, %c8_i32 : i32
    %4 = tpu.assume_multiple %3, 8 : i32
    %c0 = arith.constant 0 : index
    %5 = arith.index_cast %4 : i32 to index
    %c0_1 = arith.constant 0 : index
    %6 = vector.load %arg7[%c0, %5, %c0_1] : memref<3x8x32xbf16, #tpu.memory_space<vmem>>, vector<1x8x32xbf16>
    %7 = vector.shape_cast %6 : vector<1x8x32xbf16> to vector<8x32xbf16>
    %c1 = arith.constant 1 : index
    %c0_2 = arith.constant 0 : index
    %c0_3 = arith.constant 0 : index
    %8 = vector.load %arg7[%c1, %c0_2, %c0_3] : memref<3x8x32xbf16, #tpu.memory_space<vmem>>, vector<1x8x32xbf16>
    %9 = vector.shape_cast %8 : vector<1x8x32xbf16> to vector<8x32xbf16>
    %c2 = arith.constant 2 : index
    %c0_4 = arith.constant 0 : index
    %c0_5 = arith.constant 0 : index
    %10 = vector.load %arg7[%c2, %c0_4, %c0_5] : memref<3x8x32xbf16, #tpu.memory_space<vmem>>, vector<1x8x32xbf16>
    %11 = vector.shape_cast %10 : vector<1x8x32xbf16> to vector<8x32xbf16>
    %cst = arith.constant dense<0.000000e+00> : vector<8x8xf32>
    %12 = tpu.matmul %7, %9, %cst {dimension_numbers = #tpu.dot_dimension_numbers<[1], [1], [0], [0], [0, 0, 1, 0], [], []>} : vector<8x32xbf16>, vector<8x32xbf16>, vector<8x8xf32> -> vector<8x8xf32>
    %cst_6 = arith.constant dense<0xFF800000> : vector<8xf32>
    %13 = vector.multi_reduction <maximumf>, %12, %cst_6 [1] : vector<8x8xf32> to vector<8xf32>
    %14 = vector.shape_cast %13 : vector<8xf32> to vector<8x1xf32>
    %15 = vector.broadcast %14 : vector<8x1xf32> to vector<8x8xf32>
    %16 = arith.subf %12, %15 : vector<8x8xf32>
    %17 = arith.truncf %16 : vector<8x8xf32> to vector<8x8xbf16>
    %18 = math.exp %17 : vector<8x8xbf16>
    %19 = arith.extf %18 : vector<8x8xbf16> to vector<8x8xf32>
    %cst_7 = arith.constant dense<0.000000e+00> : vector<8xf32>
    %20 = vector.multi_reduction <add>, %19, %cst_7 [1] : vector<8x8xf32> to vector<8xf32>
    %21 = vector.shape_cast %20 : vector<8xf32> to vector<8x1xf32>
    %22 = tpu.reciprocal %21 {approx = true} : vector<8x1xf32> -> vector<8x1xf32>
    %23 = arith.truncf %22 : vector<8x1xf32> to vector<8x1xbf16>
    %24 = vector.broadcast %23 : vector<8x1xbf16> to vector<8x8xbf16>
    %25 = arith.mulf %18, %24 : vector<8x8xbf16>
    %cst_8 = arith.constant dense<0.000000e+00> : vector<8x32xf32>
    %26 = tpu.matmul %25, %11, %cst_8 {dimension_numbers = #tpu.dot_dimension_numbers<[1], [0], [0], [1], [0, 0, 1, 1], [], []>} : vector<8x8xbf16>, vector<8x32xbf16>, vector<8x32xf32> -> vector<8x32xf32>
    %c0_9 = arith.constant 0 : index
    %c0_10 = arith.constant 0 : index
    %c0_11 = arith.constant 0 : index
    %27 = vector.load %arg5[%c0_9, %c0_10, %c0_11] : memref<1x8x32xf32, #tpu.memory_space<vmem>>, vector<1x8x32xf32>
    %28 = vector.shape_cast %27 : vector<1x8x32xf32> to vector<8x32xf32>
    %29 = vector.shape_cast %26 : vector<8x32xf32> to vector<1x8x32xf32>
    tpu.vector_store %arg5[%c0_9, %c0_10, %c0_11], %29 {strides = array<i32>} : memref<1x8x32xf32, #tpu.memory_space<vmem>>, vector<1x8x32xf32>,
    %30 = arith.extf %25 : vector<8x8xbf16> to vector<8x8xf32>
    %c0_12 = arith.constant 0 : index
    %c0_13 = arith.constant 0 : index
    %c0_14 = arith.constant 0 : index
    %31 = vector.load %arg6[%c0_12, %c0_13, %c0_14] : memref<1x8x8xf32, #tpu.memory_space<vmem>>, vector<1x8x8xf32>
    %32 = vector.shape_cast %31 : vector<1x8x8xf32> to vector<8x8xf32>
    %33 = vector.shape_cast %30 : vector<8x8xf32> to vector<1x8x8xf32>
    tpu.vector_store %arg6[%c0_12, %c0_13, %c0_14], %33 {strides = array<i32>} : memref<1x8x8xf32, #tpu.memory_space<vmem>>, vector<1x8x8xf32>,
    return
  }
  func.func @transform_0(%arg0: i32, %arg1: i32) -> (i32, i32, i32) {
    %c0_i32 = arith.constant 0 : i32
    %c0_i32_0 = arith.constant 0 : i32
    %c0_i32_1 = arith.constant 0 : i32
    return %arg0, %c0_i32, %c0_i32_0 : i32, i32, i32
  }
  func.func @transform_1(%arg0: i32, %arg1: i32) -> (i32, i32, i32) {
    %c0_i32 = arith.constant 0 : i32
    %c0_i32_0 = arith.constant 0 : i32
    %c0_i32_1 = arith.constant 0 : i32
    %c0_i32_2 = arith.constant 0 : i32
    return %c0_i32, %c0_i32_0, %c0_i32_1 : i32, i32, i32
  }
  func.func @transform_2(%arg0: i32, %arg1: i32) -> (i32, i32, i32) {
    %c0_i32 = arith.constant 0 : i32
    %c0_i32_0 = arith.constant 0 : i32
    %c0_i32_1 = arith.constant 0 : i32
    %c0_i32_2 = arith.constant 0 : i32
    return %c0_i32, %c0_i32_0, %c0_i32_1 : i32, i32, i32
  }
  func.func @transform_3(%arg0: i32, %arg1: i32) -> (i32, i32, i32) {
    %c0_i32 = arith.constant 0 : i32
    %c0_i32_0 = arith.constant 0 : i32
    return %arg0, %arg1, %c0_i32 : i32, i32, i32
  }
  func.func @transform_4(%arg0: i32, %arg1: i32) -> (i32, i32, i32) {
    %c0_i32 = arith.constant 0 : i32
    %c0_i32_0 = arith.constant 0 : i32
    return %arg0, %arg1, %c0_i32 : i32, i32, i32
  }
}

module attributes {stable_mosaic.version = 11 : i64} {
  func.func @_self_attention_kernel(%arg0: i32, %arg1: i32, %arg2: memref<1x8x32xbf16, #tpu.memory_space<vmem>>, %arg3: memref<3x32x32xbf16, #tpu.memory_space<vmem>>, %arg4: memref<3x1x32xf32, #tpu.memory_space<vmem>>, %arg5: memref<1x8x32xf32, #tpu.memory_space<vmem>>, %arg6: memref<1x8x8xf32, #tpu.memory_space<vmem>>, %arg7: memref<3x8x32xbf16, #tpu.memory_space<vmem>>) attributes {dimension_semantics = [#tpu.dimension_semantics<parallel>, #tpu.dimension_semantics<arbitrary>], iteration_bounds = array<i64: 2, 1>, scalar_prefetch = 0 : i64, scratch_operands = 1 : i64, tpu.core_type = #tpu.core_type<tc>, window_params = [{transform_indices = @transform_0, window_bounds = array<i64: 1, 8, 32>}, {pipeline_mode = #tpu.pipeline_mode<synchronous>, transform_indices = @transform_1, window_bounds = array<i64: 3, 32, 32>}, {pipeline_mode = #tpu.pipeline_mode<synchronous>, transform_indices = @transform_2, window_bounds = array<i64: 3, 1, 32>}, {transform_indices = @transform_3, window_bounds = array<i64: 1, 8, 32>}, {transform_indices = @transform_4, window_bounds = array<i64: 1, 8, 8>}]} {
    %c0_i32 = arith.constant 0 : i32
    %0 = arith.cmpi eq, %arg1, %c0_i32 : i32
    %1 = arith.extui %0 : i1 to i32
    %c0_i32_0 = arith.constant 0 : i32
    %2 = arith.cmpi ne, %1, %c0_i32_0 : i32
    scf.if %2 {
      %c0_i32_15 = arith.constant 0 : i32
      %c1_i32 = arith.constant 1 : i32
      %34 = arith.muli %c0_i32_15, %c1_i32 : i32
      %c0_i32_16 = arith.constant 0 : i32
      %35 = arith.addi %c0_i32_16, %34 : i32
      %c8_i32_17 = arith.constant 8 : i32
      %36 = arith.muli %35, %c8_i32_17 : i32
      %37 = tpu.assume_multiple %36, 8 : i32
      %c0_18 = arith.constant 0 : index
      %38 = arith.index_cast %37 : i32 to index
      %c0_19 = arith.constant 0 : index
      %39 = vector.load %arg2[%c0_18, %38, %c0_19] : memref<1x8x32xbf16, #tpu.memory_space<vmem>>, vector<1x8x32xbf16>
      %40 = vector.shape_cast %39 : vector<1x8x32xbf16> to vector<8x32xbf16>
      %c0_20 = arith.constant 0 : index
      %c0_21 = arith.constant 0 : index
      %c0_22 = arith.constant 0 : index
      %41 = vector.load %arg3[%c0_20, %c0_21, %c0_22] : memref<3x32x32xbf16, #tpu.memory_space<vmem>>, vector<1x32x32xbf16>
      %42 = vector.shape_cast %41 : vector<1x32x32xbf16> to vector<32x32xbf16>
      %cst_23 = arith.constant dense<0.000000e+00> : vector<8x32xf32>
      %43 = tpu.matmul %40, %42, %cst_23 {dimension_numbers = #tpu.dot_dimension_numbers<[1], [0], [0], [1], [0, 0, 1, 1], [], []>} : vector<8x32xbf16>, vector<32x32xbf16>, vector<8x32xf32> -> vector<8x32xf32>
      %c0_24 = arith.constant 0 : index
      %c0_25 = arith.constant 0 : index
      %c0_26 = arith.constant 0 : index
      %44 = vector.load %arg4[%c0_24, %c0_25, %c0_26] : memref<3x1x32xf32, #tpu.memory_space<vmem>>, vector<1x1x32xf32>
      %45 = vector.shape_cast %44 : vector<1x1x32xf32> to vector<1x32xf32>
      %46 = vector.broadcast %45 : vector<1x32xf32> to vector<8x32xf32>
      %47 = arith.addf %43, %46 : vector<8x32xf32>
      %48 = arith.truncf %47 : vector<8x32xf32> to vector<8x32xbf16>
      %c0_27 = arith.constant 0 : index
      %49 = arith.index_cast %37 : i32 to index
      %c0_28 = arith.constant 0 : index
      %50 = vector.load %arg7[%c0_27, %49, %c0_28] : memref<3x8x32xbf16, #tpu.memory_space<vmem>>, vector<1x8x32xbf16>
      %51 = vector.shape_cast %50 : vector<1x8x32xbf16> to vector<8x32xbf16>
      %52 = vector.shape_cast %48 : vector<8x32xbf16> to vector<1x8x32xbf16>
      tpu.vector_store %arg7[%c0_27, %49, %c0_28], %52 {strides = array<i32>} : memref<3x8x32xbf16, #tpu.memory_space<vmem>>, vector<1x8x32xbf16>,
      %c1_29 = arith.constant 1 : index
      %c0_30 = arith.constant 0 : index
      %c0_31 = arith.constant 0 : index
      %53 = vector.load %arg3[%c1_29, %c0_30, %c0_31] : memref<3x32x32xbf16, #tpu.memory_space<vmem>>, vector<1x32x32xbf16>
      %54 = vector.shape_cast %53 : vector<1x32x32xbf16> to vector<32x32xbf16>
      %cst_32 = arith.constant dense<0.000000e+00> : vector<8x32xf32>
      %55 = tpu.matmul %40, %54, %cst_32 {dimension_numbers = #tpu.dot_dimension_numbers<[1], [0], [0], [1], [0, 0, 1, 1], [], []>} : vector<8x32xbf16>, vector<32x32xbf16>, vector<8x32xf32> -> vector<8x32xf32>
      %c1_33 = arith.constant 1 : index
      %c0_34 = arith.constant 0 : index
      %c0_35 = arith.constant 0 : index
      %56 = vector.load %arg4[%c1_33, %c0_34, %c0_35] : memref<3x1x32xf32, #tpu.memory_space<vmem>>, vector<1x1x32xf32>
      %57 = vector.shape_cast %56 : vector<1x1x32xf32> to vector<1x32xf32>
      %58 = vector.broadcast %57 : vector<1x32xf32> to vector<8x32xf32>
      %59 = arith.addf %55, %58 : vector<8x32xf32>
      %60 = arith.truncf %59 : vector<8x32xf32> to vector<8x32xbf16>
      %c1_36 = arith.constant 1 : index
      %61 = arith.index_cast %37 : i32 to index
      %c0_37 = arith.constant 0 : index
      %62 = vector.load %arg7[%c1_36, %61, %c0_37] : memref<3x8x32xbf16, #tpu.memory_space<vmem>>, vector<1x8x32xbf16>
      %63 = vector.shape_cast %62 : vector<1x8x32xbf16> to vector<8x32xbf16>
      %64 = vector.shape_cast %60 : vector<8x32xbf16> to vector<1x8x32xbf16>
      tpu.vector_store %arg7[%c1_36, %61, %c0_37], %64 {strides = array<i32>} : memref<3x8x32xbf16, #tpu.memory_space<vmem>>, vector<1x8x32xbf16>,
      %c2_38 = arith.constant 2 : index
      %c0_39 = arith.constant 0 : index
      %c0_40 = arith.constant 0 : index
      %65 = vector.load %arg3[%c2_38, %c0_39, %c0_40] : memref<3x32x32xbf16, #tpu.memory_space<vmem>>, vector<1x32x32xbf16>
      %66 = vector.shape_cast %65 : vector<1x32x32xbf16> to vector<32x32xbf16>
      %cst_41 = arith.constant dense<0.000000e+00> : vector<8x32xf32>
      %67 = tpu.matmul %40, %66, %cst_41 {dimension_numbers = #tpu.dot_dimension_numbers<[1], [0], [0], [1], [0, 0, 1, 1], [], []>} : vector<8x32xbf16>, vector<32x32xbf16>, vector<8x32xf32> -> vector<8x32xf32>
      %c2_42 = arith.constant 2 : index
      %c0_43 = arith.constant 0 : index
      %c0_44 = arith.constant 0 : index
      %68 = vector.load %arg4[%c2_42, %c0_43, %c0_44] : memref<3x1x32xf32, #tpu.memory_space<vmem>>, vector<1x1x32xf32>
      %69 = vector.shape_cast %68 : vector<1x1x32xf32> to vector<1x32xf32>
      %70 = vector.broadcast %69 : vector<1x32xf32> to vector<8x32xf32>
      %71 = arith.addf %67, %70 : vector<8x32xf32>
      %72 = arith.truncf %71 : vector<8x32xf32> to vector<8x32xbf16>
      %c2_45 = arith.constant 2 : index
      %73 = arith.index_cast %37 : i32 to index
      %c0_46 = arith.constant 0 : index
      %74 = vector.load %arg7[%c2_45, %73, %c0_46] : memref<3x8x32xbf16, #tpu.memory_space<vmem>>, vector<1x8x32xbf16>
      %75 = vector.shape_cast %74 : vector<1x8x32xbf16> to vector<8x32xbf16>
      %76 = vector.shape_cast %72 : vector<8x32xbf16> to vector<1x8x32xbf16>
      tpu.vector_store %arg7[%c2_45, %73, %c0_46], %76 {strides = array<i32>} : memref<3x8x32xbf16, #tpu.memory_space<vmem>>, vector<1x8x32xbf16>,
      %c1_i32_47 = arith.constant 1 : i32
    } else {
    }
    %c8_i32 = arith.constant 8 : i32
    %3 = arith.muli %arg1, %c8_i32 : i32
    %4 = tpu.assume_multiple %3, 8 : i32
    %c0 = arith.constant 0 : index
    %5 = arith.index_cast %4 : i32 to index
    %c0_1 = arith.constant 0 : index
    %6 = vector.load %arg7[%c0, %5, %c0_1] : memref<3x8x32xbf16, #tpu.memory_space<vmem>>, vector<1x8x32xbf16>
    %7 = vector.shape_cast %6 : vector<1x8x32xbf16> to vector<8x32xbf16>
    %c1 = arith.constant 1 : index
    %c0_2 = arith.constant 0 : index
    %c0_3 = arith.constant 0 : index
    %8 = vector.load %arg7[%c1, %c0_2, %c0_3] : memref<3x8x32xbf16, #tpu.memory_space<vmem>>, vector<1x8x32xbf16>
    %9 = vector.shape_cast %8 : vector<1x8x32xbf16> to vector<8x32xbf16>
    %c2 = arith.constant 2 : index
    %c0_4 = arith.constant 0 : index
    %c0_5 = arith.constant 0 : index
    %10 = vector.load %arg7[%c2, %c0_4, %c0_5] : memref<3x8x32xbf16, #tpu.memory_space<vmem>>, vector<1x8x32xbf16>
    %11 = vector.shape_cast %10 : vector<1x8x32xbf16> to vector<8x32xbf16>
    %cst = arith.constant dense<0.000000e+00> : vector<8x8xf32>
    %12 = tpu.matmul %7, %9, %cst {dimension_numbers = #tpu.dot_dimension_numbers<[1], [1], [0], [0], [0, 0, 1, 0], [], []>} : vector<8x32xbf16>, vector<8x32xbf16>, vector<8x8xf32> -> vector<8x8xf32>
    %cst_6 = arith.constant dense<0xFF800000> : vector<8xf32>
    %13 = vector.multi_reduction <maximumf>, %12, %cst_6 [1] : vector<8x8xf32> to vector<8xf32>
    %14 = vector.shape_cast %13 : vector<8xf32> to vector<8x1xf32>
    %15 = vector.broadcast %14 : vector<8x1xf32> to vector<8x8xf32>
    %16 = arith.subf %12, %15 : vector<8x8xf32>
    %17 = arith.truncf %16 : vector<8x8xf32> to vector<8x8xbf16>
    %18 = math.exp %17 : vector<8x8xbf16>
    %19 = arith.extf %18 : vector<8x8xbf16> to vector<8x8xf32>
    %cst_7 = arith.constant dense<0.000000e+00> : vector<8xf32>
    %20 = vector.multi_reduction <add>, %19, %cst_7 [1] : vector<8x8xf32> to vector<8xf32>
    %21 = vector.shape_cast %20 : vector<8xf32> to vector<8x1xf32>
    %22 = tpu.reciprocal %21 {approx = true} : vector<8x1xf32> -> vector<8x1xf32>
    %23 = arith.truncf %22 : vector<8x1xf32> to vector<8x1xbf16>
    %24 = vector.broadcast %23 : vector<8x1xbf16> to vector<8x8xbf16>
    %25 = arith.mulf %18, %24 : vector<8x8xbf16>
    %cst_8 = arith.constant dense<0.000000e+00> : vector<8x32xf32>
    %26 = tpu.matmul %25, %11, %cst_8 {dimension_numbers = #tpu.dot_dimension_numbers<[1], [0], [0], [1], [0, 0, 1, 1], [], []>} : vector<8x8xbf16>, vector<8x32xbf16>, vector<8x32xf32> -> vector<8x32xf32>
    %c0_9 = arith.constant 0 : index
    %c0_10 = arith.constant 0 : index
    %c0_11 = arith.constant 0 : index
    %27 = vector.load %arg5[%c0_9, %c0_10, %c0_11] : memref<1x8x32xf32, #tpu.memory_space<vmem>>, vector<1x8x32xf32>
    %28 = vector.shape_cast %27 : vector<1x8x32xf32> to vector<8x32xf32>
    %29 = vector.shape_cast %26 : vector<8x32xf32> to vector<1x8x32xf32>
    tpu.vector_store %arg5[%c0_9, %c0_10, %c0_11], %29 {strides = array<i32>} : memref<1x8x32xf32, #tpu.memory_space<vmem>>, vector<1x8x32xf32>,
    %30 = arith.extf %25 : vector<8x8xbf16> to vector<8x8xf32>
    %c0_12 = arith.constant 0 : index
    %c0_13 = arith.constant 0 : index
    %c0_14 = arith.constant 0 : index
    %31 = vector.load %arg6[%c0_12, %c0_13, %c0_14] : memref<1x8x8xf32, #tpu.memory_space<vmem>>, vector<1x8x8xf32>
    %32 = vector.shape_cast %31 : vector<1x8x8xf32> to vector<8x8xf32>
    %33 = vector.shape_cast %30 : vector<8x8xf32> to vector<1x8x8xf32>
    tpu.vector_store %arg6[%c0_12, %c0_13, %c0_14], %33 {strides = array<i32>} : memref<1x8x8xf32, #tpu.memory_space<vmem>>, vector<1x8x8xf32>,
    return
  }
  func.func @transform_0(%arg0: i32, %arg1: i32) -> (i32, i32, i32) {
    %c0_i32 = arith.constant 0 : i32
    %c0_i32_0 = arith.constant 0 : i32
    %c0_i32_1 = arith.constant 0 : i32
    return %arg0, %c0_i32, %c0_i32_0 : i32, i32, i32
  }
  func.func @transform_1(%arg0: i32, %arg1: i32) -> (i32, i32, i32) {
    %c0_i32 = arith.constant 0 : i32
    %c0_i32_0 = arith.constant 0 : i32
    %c0_i32_1 = arith.constant 0 : i32
    %c0_i32_2 = arith.constant 0 : i32
    return %c0_i32, %c0_i32_0, %c0_i32_1 : i32, i32, i32
  }
  func.func @transform_2(%arg0: i32, %arg1: i32) -> (i32, i32, i32) {
    %c0_i32 = arith.constant 0 : i32
    %c0_i32_0 = arith.constant 0 : i32
    %c0_i32_1 = arith.constant 0 : i32
    %c0_i32_2 = arith.constant 0 : i32
    return %c0_i32, %c0_i32_0, %c0_i32_1 : i32, i32, i32
  }
  func.func @transform_3(%arg0: i32, %arg1: i32) -> (i32, i32, i32) {
    %c0_i32 = arith.constant 0 : i32
    %c0_i32_0 = arith.constant 0 : i32
    return %arg0, %arg1, %c0_i32 : i32, i32, i32
  }
  func.func @transform_4(%arg0: i32, %arg1: i32) -> (i32, i32, i32) {
    %c0_i32 = arith.constant 0 : i32
    %c0_i32_0 = arith.constant 0 : i32
    return %arg0, %arg1, %c0_i32 : i32, i32, i32
  }
}

</mosaic_0001>

<bundles_post_ra>
// kernel: tpu_custom_call.1
= control target key start
LH: loop header
LB: loop body
LE: loop exit
PB: predicated region body
PF: predicated region fallthrough
CT: control target
= control target key end

     0   :  { %10 = vsyncpa [#allocation4], 0  ;;  %s1213_s0 = inlined_call_operand.hbm [shape: bf16[2,8,32], index: 0, kind: input, shape index: {}]   ;;  %s1214_s1 = inlined_call_operand.hbm [shape: bf16[3,32,32], index: 1, kind: input, shape index: {}]   ;;  %s1215_s2 = inlined_call_operand.hbm [shape: f32[3,1,32], index: 2, kind: input, shape index: {}]   ;;  %s1216_s3 = inlined_call_operand.hbm [shape: f32[2,8,32], index: 3, kind: output, shape index: {0}]   ;;  %s1217_s4 = inlined_call_operand.hbm [shape: f32[2,8,8], index: 4, kind: output, shape index: {1}]  }
   0x1   :  { %12 = vsyncpa [#allocation4 + $0x1], 0 }
   0x2   :  { %13 = vsyncpa [#allocation7], 0 }
   0x3   :  { %14 = vsyncpa [#allocation5], 0 }
   0x4   :  { %16 = vsyncpa [#allocation5 + $0x1], 0 }
   0x5   :  { %17 = vsyncpa [#allocation11], 0 }
   0x6   :  { %19 = vsyncpa [#allocation11 + $0x1], 0  ;;  %s1041_s15 = smov 0   ;;  %s1043_s16 = smov 0  }
   0x7   :  { %s1045_s17 = smov 0   ;;  %s1047_s18 = smov 0  }
   0x8   :  { %s1049_s19 = smov 0   ;;  %s1051_s20 = smov 0  }
   0x9 LB: > { %s646_s21 = sadd.s32 4294967295, %s1008_s20   ;;  %p648_p0 = scmp.ge.s32.totalorder %s1008_s20, 1  ;;  %s1008_s20 = sphi %s1051_s20, %s25_s20   ;;  %s1004_s19 = sphi %s1049_s19, %s1227_s19   ;;  %s1000_s18 = sphi %s1047_s18, %s1226_s18   ;;  %s996_s17 = sphi %s1045_s17, %s1225_s17   ;;  %s992_s16 = sphi %s1043_s16, %s1224_s16   ;;  %s988_s15 = sphi %s1041_s15, %s1223_s15  }
   0xa   : > { %p1075_p1 = scmp.eq.s32.totalorder %s646_s21, 0  ;;  %p166_p2 = scmp.lt.s32.totalorder %s1008_s20, 3 }
   0xb   : > { %s177_s25 = sshll.u32 %s1214_s1, 4  ;;  %s1010_s27 = smov [#allocation6]   ;;  %s178_s25 = int_to_ptr.hbm [resolvable:$true] %s177_s25 }
   0xc   : > { %p1083_p3 = pnand %p648_p0, %p166_p2  ;;  %s179_s28 = sshll.u32 %s1010_s27, 4  ;;  %s180_s28 = int_to_ptr.vmem [resolvable:$true] %s179_s28 }
   0xd   : > { %p651_p6 = scmp.ge.s32.totalorder %s1008_s20, 2  ;;  %s191_s5 = sshll.u32 %s1215_s2, 4  ;;  %s192_s5 = int_to_ptr.hbm [resolvable:$true] %s191_s5 }
   0xe   : > { %p715_p4 = pneg %p1083_p3  ;;  %s1011_s6 = smov 64  }
   0xf   : > { %s1012_s7 = smov 4   ;;  %s1013_s8 = smov [#allocation8]  }
  0x10   : > { %p716_p5 = pnand %p715_p4, %p1075_p1  ;;  %s193_s9 = sshll.u32 %s1013_s8, 4  ;;  %s194_s9 = int_to_ptr.vmem [resolvable:$true] %s193_s9 }
  0x11   : > { %s1014_s10 = smov 16   ;;  %s1015_s11 = smov 1  }
  0x12   : > { %718 = dma.hbm_to_vmem [thread:$0]  (!%p716_p5), %s178_s25, 768, %s180_s28, [#allocation7], %s1011_s6, %s1011_s6, %s1012_s7  }
  0x13   : > { %721 = dma.hbm_to_vmem [thread:$0]  (!%p716_p5), %s192_s5, 48, %s194_s9, [#allocation7], %s1014_s10, %s1014_s10, %s1015_s11  }
  0x14   : > { %s37_s12 = sadd.s32 1, %s1004_s19  ;;  %s647_s13 = sadd.s32 4294967294, %s1008_s20  }
  0x15   : > { %p39_p7 = scmp.ge.s32.totalorder %s37_s12, 2  ;;  %s44_s14 = sadd.s32 1, %s996_s17 }
  0x16   : > { %p51_p8 = scmp.ne.s32.totalorder %s996_s17, %s992_s16  ;;  %p52_p9 = scmp.eq.s32.totalorder %s1008_s20, 0 }
  0x17   : > { %s1229_s12 = smov (%p39_p7, %s37_s12), 0  ;;  %p57_p10 = scmp.ne.s32.totalorder %s992_s16, %s988_s15 }
  0x18   : > { %s41_s23 = ssub.s32 %s1004_s19, %s1229_s12  ;;  %p125_p11 = scmp.eq.s32.totalorder %s646_s21, 1 }
  0x19   : > { %p42_p12 = scmp.eq.s32.totalorder %s41_s23, 0  ;;  %p1111_p13 = por %p1075_p1, %p57_p10 }
  0x1a   : > { %p1115_p0 = por %p125_p11, %p51_p8  ;;  %p131_p2 = scmp.eq.s32.totalorder %s647_s13, 1 }
  0x1b   : > { %s1120_s27 = scalar_select %p42_p12, %s996_s17, %s44_s14  }
  0x1c   : > { %p53_p4 = por %p52_p9, %p51_p8  ;;  %p1122_p5 = por %p131_p2, %p57_p10 }
  0x1d   : > { %s207_s29 = sand.u32 1, %s996_s17   ;;  %s653_s21 = sshll.u32 %s1004_s19, 2 }
  0x1e   : > { %p735_p7 = scmp.lt.s32.totalorder %s1008_s20, 2  ;;  %s652_s30 = sshll.u32 %s207_s29, 2 }
  0x1f   : > { %s215_s7 = scalar_lea.hbm %s1213_s0, %s653_s21  ;;  %s211_s9 = scalar_lea.vmem [#allocation3], %s652_s30 }
  0x20   : > { %s217_s8 = sshll.u32 %s215_s7, 4  ;;  %s219_s10 = sshll.u32 %s211_s9, 4  ;;  %s218_s8 = int_to_ptr.hbm [resolvable:$true] %s217_s8  ;;  %s220_s10 = int_to_ptr.vmem [resolvable:$true] %s219_s10 }
  0x21   : > { %p723_p11 = pnand %p735_p7, %p53_p4  ;;  %s208_s11 = scalar_lea.sflag [#allocation4], %s207_s29 }
  0x22   : > { %228 = sbr.rel (%p1083_p3) target bundleno = 731 (0x2db), region = 32  ;;  %s1135_s13 = sand.u32 (!%p1083_p3), 1, %s992_s16  }
  0x23   : > { %725 = dma.hbm_to_vmem [thread:$0]  (!%p723_p11), %s218_s8, 64, %s220_s10, %s208_s11  }
  0x24   : > { %s655_s14 = sshll.u32 (!%p1083_p3), %s1135_s13, 2  ;;  %s231_s23 = scalar_lea.sflag (!%p1083_p3), [#allocation4], %s1135_s13 }
  0x25   : > { %s234_s21 = scalar_lea.vmem (!%p1083_p3), [#allocation3], %s655_s14 }
  0x27   : > { %971 = dma.done.wait (%p1111_p13), %s231_s23, 64  }
  0x28   : > { %973 = vsyncadd (%p1111_p13), %s231_s23, 4294967232 }
  0x29   : > { %975 = dma.done.wait (%p1075_p1), [#allocation7], 816  }
  0x2a   : > { %977 = vsyncadd (%p1075_p1), [#allocation7], 4294966480  ;;  %v696_v0 = vld [vmem:[#allocation6 + $0x8] sm:$0xff]  ;;  %v698_v1 = vld [vmem:[#allocation6 + $0x18] sm:$0xff]  ;;  %vm301_vm0 = vcmask 261120   ;;  %vm319_vm1 = vcmask 257024  }
  0x2b   : > { %v695_v2 = vld [vmem:[#allocation6] sm:$0xff]  ;;  %311 = vmatpush.bf16.msra.mxu0 %v696_v0  ;;  %349 = vmatpush.bf16.msra.mxu1 %v698_v1  ;;  %v697_v3 = vld [vmem:[#allocation6 + $0x10] sm:$0xff]  ;;  %v280_v4 = vld [vmem:[%s234_s21] sm:$0xf]  ;;  %vm431_vm2 = vcmask 64512   ;;  %vm453_vm3 = vcmask 1043456  }
  0x2c   : > { %v793_v5 = vld [vmem:[#allocation8] ss:$0 sm:$0xff]  ;;  %v794_v6 = vld [vmem:[#allocation8 + $0x1] ss:$0 sm:$0xff]  ;;  %v700_v18 = vld [vmem:[#allocation6 + $0x28] sm:$0xff]  ;;  %s658_s22 = sshll.u32 %s1135_s13, 3 }
  0x2d   : > { %389 = vmatpush.bf16.msra.mxu2 %v700_v18  ;;  %v699_v19 = vld [vmem:[#allocation6 + $0x20] sm:$0xff]  ;;  %v795_v23 = vld [vmem:[#allocation8 + $0x2] ss:$0 sm:$0xff]  ;;  %s691_s26 = sshll.u32 %s1000_s18, 3  ;;  %s274_s24 = scalar_lea.vmem [#allocation10], %s658_s22 }
  0x2e   : > { %s505_s5 = scalar_lea.hbm %s1217_s4, %s691_s26  ;;  %s507_s6 = sshll.u32 %s274_s24, 4  ;;  %s508_s6 = int_to_ptr.vmem [resolvable:$true] %s507_s6 }
  0x2f   : > { %312 = vmatpush.bf16.msra.mxu0 %v695_v2  ;;  %350 = vmatpush.bf16.msra.mxu1 %v697_v3  ;;  %s509_s7 = sshll.u32 %s505_s5, 4  ;;  %s479_s8 = scalar_lea.sflag [#allocation11], %s1135_s13  ;;  %s510_s7 = int_to_ptr.hbm [resolvable:$true] %s509_s7 }
  0x30   : > { %s904_s9 = sshra.s32 %s510_s7, 4  ;;  %s910_s14 = scalar_lea.hbm %s1217_s4, 16  ;;  %s905_s9 = int_to_ptr.hbm [resolvable:$true] %s904_s9 }
  0x31   : > { %390 = vmatpush.bf16.msra.mxu2 %v699_v19  ;;  %s906_s10 = scalar_lea.hbm %s905_s9, 8  ;;  %p911_p9 = scmp.lt.s32.totalorder %s905_s9, %s1217_s4 }
  0x32   : > { %668 = vmatmul.msk.bf16.vlgmr.msra.gmra.mxu0 %vm301_vm0, %v280_v4  ;;  %677 = vmatmul.msk.bf16.vlgmr.msra.gmra.mxu1 %vm301_vm0, %v280_v4  ;;  %p907_p1 = scmp.ne.s32.totalorder %s905_s9, %s906_s10  ;;  %p912_p10 = scmp.lt.s32.totalorder %s910_s14, %s906_s10 }
  0x34   : > { %686 = vmatmul.msk.bf16.vlgmr.msra.gmra.mxu2 %vm301_vm0, %v280_v4  ;;  %p908_p3 = pnand %p907_p1, %p1115_p0  ;;  %p913_p12 = por %p912_p10, %p911_p9 }
  0x36   : > { %p909_p8 = pneg %p908_p3 }
  0x38   : > { %p914_p13 = pnand %p913_p12, %p909_p8 }
  0xaf   : > { %v314_v7 = vpop.f32.mrf.mxu0  ;;  %v352_v8 = vpop.f32.mrf.mxu1 }
  0xb0   : > { %v315_v9 = vadd.f32 %v793_v5, %v314_v7  ;;  %v353_v10 = vadd.f32 %v794_v6, %v352_v8 }
  0xb2   : > { %v318_v11 = vpack.c.bf16 %v315_v9, %v315_v9  ;;  %v356_v12 = vpack.c.bf16 %v353_v10, %v353_v10 }
  0xb4   : > { %320 = vst.msk [vmem:[#allocation2] sm:$0xf] %vm319_vm1, %v318_v11 }
  0xb5   : > { %360 = vst.msk [vmem:[#allocation2 + $0x4] sm:$0xf] %vm319_vm1, %v356_v12 }
  0xb7   : > { %v316_v13 = vpop.f32.mrf.mxu0  ;;  %v354_v14 = vpop.f32.mrf.mxu1 }
  0xb8   : > { %v392_v24 = vpop.f32.mrf.mxu2 }
  0xb9   : > { %v393_v26 = vadd.f32 %v795_v23, %v392_v24 }
  0xbb   : > { %v406_v17 = vld [vmem:[#allocation2] sm:$0xf]  ;;  %v396_v28 = vpack.c.bf16 %v393_v26, %v393_v26 }
  0xbc   : > { %v408_v15 = vld [vmem:[#allocation2 + $0x4] sm:$0xf] }
  0xbd   : > { %v416_v16 = vsel %vm301_vm0, %v408_v15, 0  ;;  %400 = vst.msk [vmem:[#allocation2 + $0x8] sm:$0xf] %vm319_vm1, %v396_v28 }
  0xbe   : > { %425 = vmatpush.bf16.xpose.msra.mxu3 %v416_v16 }
  0xc0   : > { %v394_v32 = vpop.f32.mrf.mxu2 }
  0xc4   : > { %v410_v33 = vld [vmem:[#allocation2 + $0x8] sm:$0xf] }
  0xc5   : > { %687 = vmatmul.msk.bf16.vlgmr.msra.gmra.mxu3 %vm301_vm0, %v406_v17  ;;  %v455_v34 = vsel %vm453_vm3, %v410_v33, 0 }
  0xc6   : > { %464 = vmatpush.bf16.msrb.mxu0 %v455_v34 }
 0x148   : > { %v427_v20 = vpop.f32.mrf.mxu3 }
 0x149   : > { %v432_v21 = vsel %vm431_vm2, %v427_v20, -inf }
 0x14a   : > { %433 = vmax.xlane.f32.xlu0 %v432_v21 }
 0x150   : > { %v429_v22 = vpop.f32.mrf.mxu3 }
 0x1bd   : > { %v434_v25 = vpop.xlane.xlu0 %433 }
 0x1be   : > { %v435_v27 = vsub.f32 %v427_v20, %v434_v25 }
 0x1c0   : > { %v436_v29 = vpack.c.bf16 %v435_v27, %v435_v27 }
 0x1c2   : > { %v437_v30 = vunpack.c.l.bf16 %v436_v29 }
 0x1c4   : > { %v438_v31 = vmul.f32 1.442695, %v437_v30 }
 0x1c6   : > { %796 = vpow2.f32 %v438_v31 }
 0x1cc   : > { %v797_v35 = vpop.eup %796 }
 0x1cd   : > { %v440_v36 = vpack.c.bf16 %v797_v35, %v797_v35 }
 0x1cf   : > { %v441_v37 = vunpack.c.l.bf16 %v440_v36 }
 0x1d1   : > { %v442_v38 = vsel %vm431_vm2, %v441_v37, 0.0 }
 0x1d2   : > { %443 = vadd.xlane.f32.xlu0 %v442_v38 }
 0x245   : > { %v444_v39 = vpop.xlane.xlu0 %443 }
 0x246   : > { %798 = vrcp.f32 %v444_v39 }
 0x24c   : > { %v799_v40 = vpop.eup %798 }
 0x24d   : > { %v446_v41 = vpack.c.bf16 %v799_v40, %v799_v40 }
 0x24f   : > { %v447_v42 = vunpack.c.l.bf16 %v446_v41 }
 0x251   : > { %v448_v43 = vmul.f32 %v447_v42, %v441_v37 }
 0x253   : > { %v449_v44 = vpack.c.bf16 %v448_v43, %v448_v43 }
 0x255   : > { %v471_v45 = vunpack.c.l.bf16 %v449_v44  ;;  %688 = vmatmul.msk.bf16.vlgmr.msrb.gmra.mxu0 %vm431_vm2, %v449_v44 }
 0x257   : > { %472 = vst.msk [vmem:[%s274_s24] sm:$0xff] %vm431_vm2, %v471_v45 }
 0x258   : > { %917 = shalt.err (!%p914_p13)
}
 0x259   : > { %712 = dma.vmem_to_hbm [thread:$0]  (%p1115_p0), %s508_s6, 128, %s510_s7, %s479_s8  }
 0x25a   : > { %s490_s30 = scalar_lea.hbm %s1216_s3, %s691_s26  ;;  %s267_s5 = scalar_lea.vmem [#allocation9], %s658_s22 }
 0x25b   : > { %s492_s18 = sshll.u32 %s267_s5, 4  ;;  %s494_s11 = sshll.u32 %s490_s30, 4  ;;  %s493_s18 = int_to_ptr.vmem [resolvable:$true] %s492_s18  ;;  %s495_s11 = int_to_ptr.hbm [resolvable:$true] %s494_s11 }
 0x25c   : > { %s474_s9 = scalar_lea.sflag [#allocation5], %s1135_s13  ;;  %s932_s10 = sshra.s32 %s495_s11, 4  ;;  %s933_s10 = int_to_ptr.hbm [resolvable:$true] %s932_s10 }
 0x25d   : > { %s934_s14 = scalar_lea.hbm %s933_s10, 8  ;;  %s938_s26 = scalar_lea.hbm %s1216_s3, 16 }
 0x25e   : > { %p935_p2 = scmp.ne.s32.totalorder %s933_s10, %s934_s14  ;;  %p939_p11 = scmp.lt.s32.totalorder %s933_s10, %s1216_s3 }
 0x25f   : > { %p940_p1 = scmp.lt.s32.totalorder %s938_s26, %s934_s14 }
 0x260   : > { %p936_p4 = pnand %p935_p2, %p1115_p0 }
 0x261   : > { %p941_p3 = por %p940_p1, %p939_p11 }
 0x262   : > { %p937_p7 = pneg %p936_p4 }
 0x264   : > { %p942_p8 = pnand %p941_p3, %p937_p7 }
 0x2d2   : > { %v466_v46 = vpop.f32.mrf.mxu0 }
 0x2d3   : > { %470 = vst.msk [vmem:[%s267_s5] sm:$0xff] %vm301_vm0, %v466_v46 }
 0x2d4   : > { %945 = shalt.err (!%p942_p8)
}
 0x2d5   : > { %711 = dma.vmem_to_hbm [thread:$0]  (%p1115_p0), %s493_s18, 128, %s495_s11, %s474_s9  }
 0x2da   : > { %v468_v47 = vpop.f32.mrf.mxu0 }
 0x2db PF: > { %s521_s13 = sand.u32 1, %s988_s15   ;;  %p727_p9 = pnand %p651_p6, %p1122_p5 }
 0x2dc   : > { %s522_s23 = scalar_lea.sflag [#allocation5], %s521_s13 }
 0x2dd   : > { %p728_p10 = pneg %p727_p9 }
 0x2df   : > { %979 = dma.done.wait (%p728_p10), %s522_s23, 128  }
 0x2e0   : > { %981 = vsyncadd (%p728_p10), %s522_s23, 4294967168  ;;  %s532_s21 = scalar_lea.sflag [#allocation11], %s521_s13 }
 0x2e1   : > { %983 = dma.done.wait (%p728_p10), %s532_s21, 128  }
 0x2e2   : > { %985 = vsyncadd (%p728_p10), %s532_s21, 4294967168  ;;  %s25_s20 = sadd.s32 1, %s1008_s20   ;;  %s1223_s15 = smov %s992_s16 }
 0x2e3   : > { %p22_p12 = scmp.ge.s32.totalorder %s25_s20, 4   ;;  %s1224_s16 = smov %s996_s17 }
 0x2e4   : > { %s1225_s17 = smov %s1120_s27  ;;  %s1226_s18 = smov %s1004_s19 }
 0x2e5   : > { %s1227_s19 = smov %s1229_s12  ;;  %24 = sbr.rel (!%p22_p12) target bundleno = 9 (0x9), region = 115 }
 0x2ea   :  { %538 = vsyncpa [#allocation4], 1 }
 0x2eb   :  { %540 = vsyncpa [#allocation4 + $0x1], 1 }
 0x2ec   :  { %541 = vsyncpa [#allocation7], 1 }
 0x2ed   :  { %542 = vsyncpa [#allocation5], 1 }
 0x2ee   :  { %544 = vsyncpa [#allocation5 + $0x1], 1 }
 0x2ef   :  { %545 = vsyncpa [#allocation11], 1 }
 0x2f0   :  { %547 = vsyncpa [#allocation11 + $0x1], 1 }

// kernel: tpu_custom_call.1
= control target key start
LH: loop header
LB: loop body
LE: loop exit
PB: predicated region body
PF: predicated region fallthrough
CT: control target
= control target key end

     0   :  { %10 = vsyncpa [#allocation4], 0  ;;  %s1213_s0 = inlined_call_operand.hbm [shape: bf16[2,8,32], index: 0, kind: input, shape index: {}]   ;;  %s1214_s1 = inlined_call_operand.hbm [shape: bf16[3,32,32], index: 1, kind: input, shape index: {}]   ;;  %s1215_s2 = inlined_call_operand.hbm [shape: f32[3,1,32], index: 2, kind: input, shape index: {}]   ;;  %s1216_s3 = inlined_call_operand.hbm [shape: f32[2,8,32], index: 3, kind: output, shape index: {0}]   ;;  %s1217_s4 = inlined_call_operand.hbm [shape: f32[2,8,8], index: 4, kind: output, shape index: {1}]  }
   0x1   :  { %12 = vsyncpa [#allocation4 + $0x1], 0 }
   0x2   :  { %13 = vsyncpa [#allocation7], 0 }
   0x3   :  { %14 = vsyncpa [#allocation5], 0 }
   0x4   :  { %16 = vsyncpa [#allocation5 + $0x1], 0 }
   0x5   :  { %17 = vsyncpa [#allocation11], 0 }
   0x6   :  { %19 = vsyncpa [#allocation11 + $0x1], 0  ;;  %s1041_s15 = smov 0   ;;  %s1043_s16 = smov 0  }
   0x7   :  { %s1045_s17 = smov 0   ;;  %s1047_s18 = smov 0  }
   0x8   :  { %s1049_s19 = smov 0   ;;  %s1051_s20 = smov 0  }
   0x9 LB: > { %s646_s21 = sadd.s32 4294967295, %s1008_s20   ;;  %p648_p0 = scmp.ge.s32.totalorder %s1008_s20, 1  ;;  %s1008_s20 = sphi %s1051_s20, %s25_s20   ;;  %s1004_s19 = sphi %s1049_s19, %s1227_s19   ;;  %s1000_s18 = sphi %s1047_s18, %s1226_s18   ;;  %s996_s17 = sphi %s1045_s17, %s1225_s17   ;;  %s992_s16 = sphi %s1043_s16, %s1224_s16   ;;  %s988_s15 = sphi %s1041_s15, %s1223_s15  }
   0xa   : > { %p1075_p1 = scmp.eq.s32.totalorder %s646_s21, 0  ;;  %p166_p2 = scmp.lt.s32.totalorder %s1008_s20, 3 }
   0xb   : > { %s177_s25 = sshll.u32 %s1214_s1, 4  ;;  %s1010_s27 = smov [#allocation6]   ;;  %s178_s25 = int_to_ptr.hbm [resolvable:$true] %s177_s25 }
   0xc   : > { %p1083_p3 = pnand %p648_p0, %p166_p2  ;;  %s179_s28 = sshll.u32 %s1010_s27, 4  ;;  %s180_s28 = int_to_ptr.vmem [resolvable:$true] %s179_s28 }
   0xd   : > { %p651_p6 = scmp.ge.s32.totalorder %s1008_s20, 2  ;;  %s191_s5 = sshll.u32 %s1215_s2, 4  ;;  %s192_s5 = int_to_ptr.hbm [resolvable:$true] %s191_s5 }
   0xe   : > { %p715_p4 = pneg %p1083_p3  ;;  %s1011_s6 = smov 64  }
   0xf   : > { %s1012_s7 = smov 4   ;;  %s1013_s8 = smov [#allocation8]  }
  0x10   : > { %p716_p5 = pnand %p715_p4, %p1075_p1  ;;  %s193_s9 = sshll.u32 %s1013_s8, 4  ;;  %s194_s9 = int_to_ptr.vmem [resolvable:$true] %s193_s9 }
  0x11   : > { %s1014_s10 = smov 16   ;;  %s1015_s11 = smov 1  }
  0x12   : > { %718 = dma.hbm_to_vmem [thread:$0]  (!%p716_p5), %s178_s25, 768, %s180_s28, [#allocation7], %s1011_s6, %s1011_s6, %s1012_s7  }
  0x13   : > { %721 = dma.hbm_to_vmem [thread:$0]  (!%p716_p5), %s192_s5, 48, %s194_s9, [#allocation7], %s1014_s10, %s1014_s10, %s1015_s11  }
  0x14   : > { %s37_s12 = sadd.s32 1, %s1004_s19  ;;  %s647_s13 = sadd.s32 4294967294, %s1008_s20  }
  0x15   : > { %p39_p7 = scmp.ge.s32.totalorder %s37_s12, 2  ;;  %s44_s14 = sadd.s32 1, %s996_s17 }
  0x16   : > { %p51_p8 = scmp.ne.s32.totalorder %s996_s17, %s992_s16  ;;  %p52_p9 = scmp.eq.s32.totalorder %s1008_s20, 0 }
  0x17   : > { %s1229_s12 = smov (%p39_p7, %s37_s12), 0  ;;  %p57_p10 = scmp.ne.s32.totalorder %s992_s16, %s988_s15 }
  0x18   : > { %s41_s23 = ssub.s32 %s1004_s19, %s1229_s12  ;;  %p125_p11 = scmp.eq.s32.totalorder %s646_s21, 1 }
  0x19   : > { %p42_p12 = scmp.eq.s32.totalorder %s41_s23, 0  ;;  %p1111_p13 = por %p1075_p1, %p57_p10 }
  0x1a   : > { %p1115_p0 = por %p125_p11, %p51_p8  ;;  %p131_p2 = scmp.eq.s32.totalorder %s647_s13, 1 }
  0x1b   : > { %s1120_s27 = scalar_select %p42_p12, %s996_s17, %s44_s14  }
  0x1c   : > { %p53_p4 = por %p52_p9, %p51_p8  ;;  %p1122_p5 = por %p131_p2, %p57_p10 }
  0x1d   : > { %s207_s29 = sand.u32 1, %s996_s17   ;;  %s653_s21 = sshll.u32 %s1004_s19, 2 }
  0x1e   : > { %p735_p7 = scmp.lt.s32.totalorder %s1008_s20, 2  ;;  %s652_s30 = sshll.u32 %s207_s29, 2 }
  0x1f   : > { %s215_s7 = scalar_lea.hbm %s1213_s0, %s653_s21  ;;  %s211_s9 = scalar_lea.vmem [#allocation3], %s652_s30 }
  0x20   : > { %s217_s8 = sshll.u32 %s215_s7, 4  ;;  %s219_s10 = sshll.u32 %s211_s9, 4  ;;  %s218_s8 = int_to_ptr.hbm [resolvable:$true] %s217_s8  ;;  %s220_s10 = int_to_ptr.vmem [resolvable:$true] %s219_s10 }
  0x21   : > { %p723_p11 = pnand %p735_p7, %p53_p4  ;;  %s208_s11 = scalar_lea.sflag [#allocation4], %s207_s29 }
  0x22   : > { %228 = sbr.rel (%p1083_p3) target bundleno = 731 (0x2db), region = 32  ;;  %s1135_s13 = sand.u32 (!%p1083_p3), 1, %s992_s16  }
  0x23   : > { %725 = dma.hbm_to_vmem [thread:$0]  (!%p723_p11), %s218_s8, 64, %s220_s10, %s208_s11  }
  0x24   : > { %s655_s14 = sshll.u32 (!%p1083_p3), %s1135_s13, 2  ;;  %s231_s23 = scalar_lea.sflag (!%p1083_p3), [#allocation4], %s1135_s13 }
  0x25   : > { %s234_s21 = scalar_lea.vmem (!%p1083_p3), [#allocation3], %s655_s14 }
  0x27   : > { %971 = dma.done.wait (%p1111_p13), %s231_s23, 64  }
  0x28   : > { %973 = vsyncadd (%p1111_p13), %s231_s23, 4294967232 }
  0x29   : > { %975 = dma.done.wait (%p1075_p1), [#allocation7], 816  }
  0x2a   : > { %977 = vsyncadd (%p1075_p1), [#allocation7], 4294966480  ;;  %v696_v0 = vld [vmem:[#allocation6 + $0x8] sm:$0xff]  ;;  %v698_v1 = vld [vmem:[#allocation6 + $0x18] sm:$0xff]  ;;  %vm301_vm0 = vcmask 261120   ;;  %vm319_vm1 = vcmask 257024  }
  0x2b   : > { %v695_v2 = vld [vmem:[#allocation6] sm:$0xff]  ;;  %311 = vmatpush.bf16.msra.mxu0 %v696_v0  ;;  %349 = vmatpush.bf16.msra.mxu1 %v698_v1  ;;  %v697_v3 = vld [vmem:[#allocation6 + $0x10] sm:$0xff]  ;;  %v280_v4 = vld [vmem:[%s234_s21] sm:$0xf]  ;;  %vm431_vm2 = vcmask 64512   ;;  %vm453_vm3 = vcmask 1043456  }
  0x2c   : > { %v793_v5 = vld [vmem:[#allocation8] ss:$0 sm:$0xff]  ;;  %v794_v6 = vld [vmem:[#allocation8 + $0x1] ss:$0 sm:$0xff]  ;;  %v700_v18 = vld [vmem:[#allocation6 + $0x28] sm:$0xff]  ;;  %s658_s22 = sshll.u32 %s1135_s13, 3 }
  0x2d   : > { %389 = vmatpush.bf16.msra.mxu2 %v700_v18  ;;  %v699_v19 = vld [vmem:[#allocation6 + $0x20] sm:$0xff]  ;;  %v795_v23 = vld [vmem:[#allocation8 + $0x2] ss:$0 sm:$0xff]  ;;  %s691_s26 = sshll.u32 %s1000_s18, 3  ;;  %s274_s24 = scalar_lea.vmem [#allocation10], %s658_s22 }
  0x2e   : > { %s505_s5 = scalar_lea.hbm %s1217_s4, %s691_s26  ;;  %s507_s6 = sshll.u32 %s274_s24, 4  ;;  %s508_s6 = int_to_ptr.vmem [resolvable:$true] %s507_s6 }
  0x2f   : > { %312 = vmatpush.bf16.msra.mxu0 %v695_v2  ;;  %350 = vmatpush.bf16.msra.mxu1 %v697_v3  ;;  %s509_s7 = sshll.u32 %s505_s5, 4  ;;  %s479_s8 = scalar_lea.sflag [#allocation11], %s1135_s13  ;;  %s510_s7 = int_to_ptr.hbm [resolvable:$true] %s509_s7 }
  0x30   : > { %s904_s9 = sshra.s32 %s510_s7, 4  ;;  %s910_s14 = scalar_lea.hbm %s1217_s4, 16  ;;  %s905_s9 = int_to_ptr.hbm [resolvable:$true] %s904_s9 }
  0x31   : > { %390 = vmatpush.bf16.msra.mxu2 %v699_v19  ;;  %s906_s10 = scalar_lea.hbm %s905_s9, 8  ;;  %p911_p9 = scmp.lt.s32.totalorder %s905_s9, %s1217_s4 }
  0x32   : > { %668 = vmatmul.msk.bf16.vlgmr.msra.gmra.mxu0 %vm301_vm0, %v280_v4  ;;  %677 = vmatmul.msk.bf16.vlgmr.msra.gmra.mxu1 %vm301_vm0, %v280_v4  ;;  %p907_p1 = scmp.ne.s32.totalorder %s905_s9, %s906_s10  ;;  %p912_p10 = scmp.lt.s32.totalorder %s910_s14, %s906_s10 }
  0x34   : > { %686 = vmatmul.msk.bf16.vlgmr.msra.gmra.mxu2 %vm301_vm0, %v280_v4  ;;  %p908_p3 = pnand %p907_p1, %p1115_p0  ;;  %p913_p12 = por %p912_p10, %p911_p9 }
  0x36   : > { %p909_p8 = pneg %p908_p3 }
  0x38   : > { %p914_p13 = pnand %p913_p12, %p909_p8 }
  0xaf   : > { %v314_v7 = vpop.f32.mrf.mxu0  ;;  %v352_v8 = vpop.f32.mrf.mxu1 }
  0xb0   : > { %v315_v9 = vadd.f32 %v793_v5, %v314_v7  ;;  %v353_v10 = vadd.f32 %v794_v6, %v352_v8 }
  0xb2   : > { %v318_v11 = vpack.c.bf16 %v315_v9, %v315_v9  ;;  %v356_v12 = vpack.c.bf16 %v353_v10, %v353_v10 }
  0xb4   : > { %320 = vst.msk [vmem:[#allocation2] sm:$0xf] %vm319_vm1, %v318_v11 }
  0xb5   : > { %360 = vst.msk [vmem:[#allocation2 + $0x4] sm:$0xf] %vm319_vm1, %v356_v12 }
  0xb7   : > { %v316_v13 = vpop.f32.mrf.mxu0  ;;  %v354_v14 = vpop.f32.mrf.mxu1 }
  0xb8   : > { %v392_v24 = vpop.f32.mrf.mxu2 }
  0xb9   : > { %v393_v26 = vadd.f32 %v795_v23, %v392_v24 }
  0xbb   : > { %v406_v17 = vld [vmem:[#allocation2] sm:$0xf]  ;;  %v396_v28 = vpack.c.bf16 %v393_v26, %v393_v26 }
  0xbc   : > { %v408_v15 = vld [vmem:[#allocation2 + $0x4] sm:$0xf] }
  0xbd   : > { %v416_v16 = vsel %vm301_vm0, %v408_v15, 0  ;;  %400 = vst.msk [vmem:[#allocation2 + $0x8] sm:$0xf] %vm319_vm1, %v396_v28 }
  0xbe   : > { %425 = vmatpush.bf16.xpose.msra.mxu3 %v416_v16 }
  0xc0   : > { %v394_v32 = vpop.f32.mrf.mxu2 }
  0xc4   : > { %v410_v33 = vld [vmem:[#allocation2 + $0x8] sm:$0xf] }
  0xc5   : > { %687 = vmatmul.msk.bf16.vlgmr.msra.gmra.mxu3 %vm301_vm0, %v406_v17  ;;  %v455_v34 = vsel %vm453_vm3, %v410_v33, 0 }
  0xc6   : > { %464 = vmatpush.bf16.msrb.mxu0 %v455_v34 }
 0x148   : > { %v427_v20 = vpop.f32.mrf.mxu3 }
 0x149   : > { %v432_v21 = vsel %vm431_vm2, %v427_v20, -inf }
 0x14a   : > { %433 = vmax.xlane.f32.xlu0 %v432_v21 }
 0x150   : > { %v429_v22 = vpop.f32.mrf.mxu3 }
 0x1bd   : > { %v434_v25 = vpop.xlane.xlu0 %433 }
 0x1be   : > { %v435_v27 = vsub.f32 %v427_v20, %v434_v25 }
 0x1c0   : > { %v436_v29 = vpack.c.bf16 %v435_v27, %v435_v27 }
 0x1c2   : > { %v437_v30 = vunpack.c.l.bf16 %v436_v29 }
 0x1c4   : > { %v438_v31 = vmul.f32 1.442695, %v437_v30 }
 0x1c6   : > { %796 = vpow2.f32 %v438_v31 }
 0x1cc   : > { %v797_v35 = vpop.eup %796 }
 0x1cd   : > { %v440_v36 = vpack.c.bf16 %v797_v35, %v797_v35 }
 0x1cf   : > { %v441_v37 = vunpack.c.l.bf16 %v440_v36 }
 0x1d1   : > { %v442_v38 = vsel %vm431_vm2, %v441_v37, 0.0 }
 0x1d2   : > { %443 = vadd.xlane.f32.xlu0 %v442_v38 }
 0x245   : > { %v444_v39 = vpop.xlane.xlu0 %443 }
 0x246   : > { %798 = vrcp.f32 %v444_v39 }
 0x24c   : > { %v799_v40 = vpop.eup %798 }
 0x24d   : > { %v446_v41 = vpack.c.bf16 %v799_v40, %v799_v40 }
 0x24f   : > { %v447_v42 = vunpack.c.l.bf16 %v446_v41 }
 0x251   : > { %v448_v43 = vmul.f32 %v447_v42, %v441_v37 }
 0x253   : > { %v449_v44 = vpack.c.bf16 %v448_v43, %v448_v43 }
 0x255   : > { %v471_v45 = vunpack.c.l.bf16 %v449_v44  ;;  %688 = vmatmul.msk.bf16.vlgmr.msrb.gmra.mxu0 %vm431_vm2, %v449_v44 }
 0x257   : > { %472 = vst.msk [vmem:[%s274_s24] sm:$0xff] %vm431_vm2, %v471_v45 }
 0x258   : > { %917 = shalt.err (!%p914_p13)
}
 0x259   : > { %712 = dma.vmem_to_hbm [thread:$0]  (%p1115_p0), %s508_s6, 128, %s510_s7, %s479_s8  }
 0x25a   : > { %s490_s30 = scalar_lea.hbm %s1216_s3, %s691_s26  ;;  %s267_s5 = scalar_lea.vmem [#allocation9], %s658_s22 }
 0x25b   : > { %s492_s18 = sshll.u32 %s267_s5, 4  ;;  %s494_s11 = sshll.u32 %s490_s30, 4  ;;  %s493_s18 = int_to_ptr.vmem [resolvable:$true] %s492_s18  ;;  %s495_s11 = int_to_ptr.hbm [resolvable:$true] %s494_s11 }
 0x25c   : > { %s474_s9 = scalar_lea.sflag [#allocation5], %s1135_s13  ;;  %s932_s10 = sshra.s32 %s495_s11, 4  ;;  %s933_s10 = int_to_ptr.hbm [resolvable:$true] %s932_s10 }
 0x25d   : > { %s934_s14 = scalar_lea.hbm %s933_s10, 8  ;;  %s938_s26 = scalar_lea.hbm %s1216_s3, 16 }
 0x25e   : > { %p935_p2 = scmp.ne.s32.totalorder %s933_s10, %s934_s14  ;;  %p939_p11 = scmp.lt.s32.totalorder %s933_s10, %s1216_s3 }
 0x25f   : > { %p940_p1 = scmp.lt.s32.totalorder %s938_s26, %s934_s14 }
 0x260   : > { %p936_p4 = pnand %p935_p2, %p1115_p0 }
 0x261   : > { %p941_p3 = por %p940_p1, %p939_p11 }
 0x262   : > { %p937_p7 = pneg %p936_p4 }
 0x264   : > { %p942_p8 = pnand %p941_p3, %p937_p7 }
 0x2d2   : > { %v466_v46 = vpop.f32.mrf.mxu0 }
 0x2d3   : > { %470 = vst.msk [vmem:[%s267_s5] sm:$0xff] %vm301_vm0, %v466_v46 }
 0x2d4   : > { %945 = shalt.err (!%p942_p8)
}
 0x2d5   : > { %711 = dma.vmem_to_hbm [thread:$0]  (%p1115_p0), %s493_s18, 128, %s495_s11, %s474_s9  }
 0x2da   : > { %v468_v47 = vpop.f32.mrf.mxu0 }
 0x2db PF: > { %s521_s13 = sand.u32 1, %s988_s15   ;;  %p727_p9 = pnand %p651_p6, %p1122_p5 }
 0x2dc   : > { %s522_s23 = scalar_lea.sflag [#allocation5], %s521_s13 }
 0x2dd   : > { %p728_p10 = pneg %p727_p9 }
 0x2df   : > { %979 = dma.done.wait (%p728_p10), %s522_s23, 128  }
 0x2e0   : > { %981 = vsyncadd (%p728_p10), %s522_s23, 4294967168  ;;  %s532_s21 = scalar_lea.sflag [#allocation11], %s521_s13 }
 0x2e1   : > { %983 = dma.done.wait (%p728_p10), %s532_s21, 128  }
 0x2e2   : > { %985 = vsyncadd (%p728_p10), %s532_s21, 4294967168  ;;  %s25_s20 = sadd.s32 1, %s1008_s20   ;;  %s1223_s15 = smov %s992_s16 }
 0x2e3   : > { %p22_p12 = scmp.ge.s32.totalorder %s25_s20, 4   ;;  %s1224_s16 = smov %s996_s17 }
 0x2e4   : > { %s1225_s17 = smov %s1120_s27  ;;  %s1226_s18 = smov %s1004_s19 }
 0x2e5   : > { %s1227_s19 = smov %s1229_s12  ;;  %24 = sbr.rel (!%p22_p12) target bundleno = 9 (0x9), region = 115 }
 0x2ea   :  { %538 = vsyncpa [#allocation4], 1 }
 0x2eb   :  { %540 = vsyncpa [#allocation4 + $0x1], 1 }
 0x2ec   :  { %541 = vsyncpa [#allocation7], 1 }
 0x2ed   :  { %542 = vsyncpa [#allocation5], 1 }
 0x2ee   :  { %544 = vsyncpa [#allocation5 + $0x1], 1 }
 0x2ef   :  { %545 = vsyncpa [#allocation11], 1 }
 0x2f0   :  { %547 = vsyncpa [#allocation11 + $0x1], 1 }

</bundles_post_ra>
